<compile_context>
chip_gen: v5e
topology: v5e:2x2
jax: 0.10.0
libtpu: 0.0.40
codegen_flags: <defaults>
</compile_context>

<pallas_src>
import functools

import jax
import jax.numpy as jnp
from jax import lax
from jax.experimental import pallas as pl
from jax.experimental.pallas import tpu as pltpu


def _round_up(x, m):
    return ((x + m - 1) // m) * m


def _experts_avg_kernel(x_ref, w1_ref, b1_ref, w2_ref, b2_ref, o_ref, *,
                        num_experts, d_in, sub_rows, matmul_dtype, approx_recip):
    """Fused experts forward: per-expert MLP -> softmax -> running mean.

    x_ref : (tb, E*D)   flattened per-expert channels (matmul dtype), lane-dense
    w1_ref: (E, D, Hp)  expert hidden weights (Hd zero-padded to Hp lanes)
    b1_ref: (E, 1, Hp)  expert hidden biases, f32, zero-padded
    w2_ref: (E, Hp, Cp) expert classifier weights, zero-padded rows/cols
    b2_ref: (E, 1, Cp)  expert classifier biases, f32; padded class lanes = -1e30
                        (the softmax mask is baked in here)
    o_ref : (tb, Cp)    averaged class probabilities (valid lanes: [:num_classes])
    """
    tb = x_ref.shape[0]
    cp = o_ref.shape[-1]
    assert tb % sub_rows == 0
    num_sub = tb // sub_rows

    def do_rows(r):
        # r is a multiple of sub_rows; acc/logits/p are (sub_rows, Cp) f32,
        # small enough to live in vregs without spilling.
        acc = jnp.zeros((sub_rows, cp), jnp.float32)
        # Static unroll over experts: E is small, weights are VMEM-resident, and
        # one pass lets the scheduler interleave all experts' MXU/EUP/VPU work.
        for e in range(num_experts):
            xe = x_ref[pl.ds(r, sub_rows), pl.ds(e * d_in, d_in)]   # 128-aligned lane slice
            h = jnp.dot(xe, w1_ref[e],
                        preferred_element_type=jnp.float32) + b1_ref[e]
            h = jnp.maximum(h, 0.0)                                 # ReLU
            logits = jnp.dot(h.astype(matmul_dtype), w2_ref[e],
                             preferred_element_type=jnp.float32) + b2_ref[e]
            # Padded class lanes already hold -1e30 (from b2), so exp() -> 0.

            # softmax over the class dimension (PyTorch dim=1 of [B, C]),
            # with 1/num_experts folded into the denominator.
            m = jnp.max(logits, axis=-1, keepdims=True)
            p = jnp.exp(logits - m)
            denom = jnp.sum(p, axis=-1, keepdims=True) * num_experts
            inv = pl.reciprocal(denom, approx=True) if approx_recip else 1.0 / denom
            acc = acc + p * inv                                     # running mean over experts
        o_ref[pl.ds(r, sub_rows), :] = acc.astype(o_ref.dtype)

    if num_sub == 1:
        do_rows(0)
    else:
        def body(i, carry):
            do_rows(pl.multiple_of(i * sub_rows, sub_rows))
            return carry
        lax.fori_loop(0, num_sub, body, 0)


@functools.partial(jax.jit, static_argnames=("precise",))
def experts_avg(x, w1, b1, w2, b2, *, precise=False):
    """x: [B, E, H, W] f32. w1: [E, D, Hd], b1: [E, 1, Hd], w2: [E, Hd, C], b2: [E, 1, C].

    precise=False (default): bf16 MXU operands (f32 accumulation) + approx
    reciprocal -- the fast path for v5e/v6e/v7x.  precise=True: f32 operands and
    an exact divide, faithful to the f32 module semantics for verification.
    """
    B, E, H, W = x.shape
    D = H * W
    Hd = w1.shape[-1]
    C = w2.shape[-1]
    Cp = _round_up(C, 128)                        # lane-dense class dim
    Hp = _round_up(Hd, 128)                       # lane-dense hidden dim

    matmul_dtype = jnp.float32 if precise else jnp.bfloat16
    itemsize = jnp.dtype(matmul_dtype).itemsize

    # --- wrapper-side operand prep (padding + dtype, done once, outside the kernel) ---
    # NCHW is contiguous: [B, E, H, W] -> [B, E*D] is a free reshape.
    x_flat = x.reshape(B, E * D).astype(matmul_dtype)
    w1_p = jnp.pad(w1, ((0, 0), (0, 0), (0, Hp - Hd))).astype(matmul_dtype)
    b1_p = jnp.pad(b1, ((0, 0), (0, 0), (0, Hp - Hd)))                 # f32
    w2_p = jnp.pad(w2, ((0, 0), (0, Hp - Hd), (0, Cp - C))).astype(matmul_dtype)
    # Bake the class-pad mask into the bias: padded logits become exactly -1e30,
    # so their softmax weight is exactly 0 (w2's padded columns are zero).
    b2_p = jnp.pad(b2, ((0, 0), (0, 0), (0, Cp - C)), constant_values=-1e30)  # f32

    # --- batch tiling ---
    SB = 128     # in-kernel softmax sub-block rows: bounds the (rows, Cp) f32 vreg live set
    TB = 512     # max batch-tile rows per grid step: amortizes ~0.35us/step, big x DMAs
    if B <= SB:
        tb = B                                    # block == full array dim (no alignment issue)
        sb = B
    else:
        sb = SB
        # Aim for >=2 grid steps so dimension_semantics=("parallel",) can shard
        # the batch across v7x's two TensorCores.
        tb = min(TB, _round_up(-(-B // 2), SB))   # multiple of SB, at most TB
    B_pad = _round_up(B, tb)
    nb = B_pad // tb
    if B_pad != B:
        # Wrapper-side batch padding instead of a "one giant block" fallback;
        # padded rows produce harmless finite softmaxes and are sliced off below.
        x_flat = jnp.pad(x_flat, ((0, B_pad - B), (0, 0)))

    # --- VMEM budget / cost hints ---
    weight_bytes = E * (D * Hp + Hp * Cp) * itemsize + E * (Hp + Cp) * 4
    vmem_est = (2 * tb * E * D * itemsize         # x tile, double-buffered
                + 2 * weight_bytes                # weights/biases (default 2x buffering)
                + 2 * tb * Cp * 4)                # out tile, double-buffered
    # Explicit limit, capped at v7x's 64 MiB physical VMEM (fine on v5e/v6e too).
    vmem_limit = min(max(4 * vmem_est, 32 * 1024 * 1024), 64 * 1024 * 1024)

    cost = pl.CostEstimate(
        flops=2 * B_pad * E * (D * Hp + Hp * Cp) + 6 * B_pad * E * Cp,
        transcendentals=B_pad * E * Cp,           # exp in the softmax
        bytes_accessed=(B_pad * E * D * itemsize + weight_bytes + B_pad * Cp * 4),
    )

    kernel = functools.partial(
        _experts_avg_kernel,
        num_experts=E,
        d_in=D,
        sub_rows=sb,
        matmul_dtype=matmul_dtype,
        approx_recip=not precise,
    )

    out_p = pl.pallas_call(
        kernel,
        out_shape=jax.ShapeDtypeStruct((B_pad, Cp), jnp.float32),
        grid_spec=pltpu.PrefetchScalarGridSpec(
            num_scalar_prefetch=0,
            grid=(nb,),
            in_specs=[
                pl.BlockSpec((tb, E * D), lambda i: (i, 0)),       # x batch tile
                pl.BlockSpec((E, D, Hp), lambda i: (0, 0, 0)),     # w1 (grid-invariant)
                pl.BlockSpec((E, 1, Hp), lambda i: (0, 0, 0)),     # b1
                pl.BlockSpec((E, Hp, Cp), lambda i: (0, 0, 0)),    # w2 (padded)
                pl.BlockSpec((E, 1, Cp), lambda i: (0, 0, 0)),     # b2 (mask baked in)
            ],
            out_specs=pl.BlockSpec((tb, Cp), lambda i: (i, 0)),    # lane-dense output
        ),
        compiler_params=pltpu.CompilerParams(
            dimension_semantics=("parallel",),    # independent batch tiles -> megacore-shardable
            vmem_limit_bytes=vmem_limit,
        ),
        cost_estimate=cost,
    )(x_flat, w1_p, b1_p, w2_p, b2_p)

    return out_p[:B, :C]


def experts_avg_reference(x, w1, b1, w2, b2):
    """Plain-JAX f32 reference of the module's forward pass."""
    B, E, H, W = x.shape
    x_flat = jnp.transpose(x, (1, 0, 2, 3)).reshape(E, B, H * W)   # [E, B, D]
    h = jnp.maximum(jnp.einsum("ebd,edh->ebh", x_flat, w1) + b1, 0.0)
    logits = jnp.einsum("ebh,ehc->ebc", h, w2) + b2
    p = jax.nn.softmax(logits, axis=-1)                            # softmax over classes
    return jnp.sum(p, axis=0) / E                                  # average over experts


if __name__ == "__main__":
    # Small deterministic shapes consistent with the module's forward:
    #   batch B=8, experts/channels E=4, spatial 16x16, hidden 32, classes 5
    B, E, H, W = 8, 4, 16, 16
    D, Hd, C = H * W, 32, 5

    key = jax.random.PRNGKey(0)
    kx, k1, k2, k3, k4 = jax.random.split(key, 5)

    x = jax.random.normal(kx, (B, E, H, W), dtype=jnp.float32)

    # deterministic xavier-normal-style init for the synthetic expert weights
    w1 = jax.random.normal(k1, (E, D, Hd), dtype=jnp.float32) * jnp.sqrt(2.0 / (D + Hd))
    b1 = jax.random.normal(k2, (E, 1, Hd), dtype=jnp.float32) * 0.01
    w2 = jax.random.normal(k3, (E, Hd, C), dtype=jnp.float32) * jnp.sqrt(2.0 / (Hd + C))
    b2 = jax.random.normal(k4, (E, 1, C), dtype=jnp.float32) * 0.01

    ref = experts_avg_reference(x, w1, b1, w2, b2)

    # Precise path: f32 MXU operands + exact divide -> tight match vs f32 reference.
    out_precise = jax.block_until_ready(experts_avg(x, w1, b1, w2, b2, precise=True))
    assert out_precise.shape == (B, C), out_precise.shape
    assert jnp.allclose(out_precise, ref, atol=1e-5, rtol=1e-5), (
        "precise path mismatch, max|diff|=%e"
        % float(jnp.max(jnp.abs(out_precise - ref))))

    # Fast path (default): bf16 operands (f32 accumulation) + approx reciprocal.
    out_fast = jax.block_until_ready(experts_avg(x, w1, b1, w2, b2))
    assert out_fast.shape == (B, C), out_fast.shape
    assert jnp.allclose(out_fast, ref, atol=3e-2, rtol=0), (
        "fast path mismatch, max|diff|=%e"
        % float(jnp.max(jnp.abs(out_fast - ref))))

    print("KERNEL_OK")
</pallas_src>

<mosaic_0001>
module attributes {stable_mosaic.version = 11 : i64} {
  func.func @_experts_avg_kernel(%arg0: i32, %arg1: memref<8x1024xf32, #tpu.memory_space<vmem>>, %arg2: memref<4x256x128xf32, #tpu.memory_space<vmem>>, %arg3: memref<4x1x128xf32, #tpu.memory_space<vmem>>, %arg4: memref<4x128x128xf32, #tpu.memory_space<vmem>>, %arg5: memref<4x1x128xf32, #tpu.memory_space<vmem>>, %arg6: memref<8x128xf32, #tpu.memory_space<vmem>>) attributes {dimension_semantics = [#tpu.dimension_semantics<parallel>], iteration_bounds = array<i64: 1>, scalar_prefetch = 0 : i64, scratch_operands = 0 : i64, tpu.core_type = #tpu.core_type<tc>, window_params = [{transform_indices = @transform_0, window_bounds = array<i64: 8, 1024>}, {pipeline_mode = #tpu.pipeline_mode<synchronous>, transform_indices = @transform_1, window_bounds = array<i64: 4, 256, 128>}, {pipeline_mode = #tpu.pipeline_mode<synchronous>, transform_indices = @transform_2, window_bounds = array<i64: 4, 1, 128>}, {pipeline_mode = #tpu.pipeline_mode<synchronous>, transform_indices = @transform_3, window_bounds = array<i64: 4, 128, 128>}, {pipeline_mode = #tpu.pipeline_mode<synchronous>, transform_indices = @transform_4, window_bounds = array<i64: 4, 1, 128>}, {transform_indices = @transform_5, window_bounds = array<i64: 8, 128>}]} {
    %cst = arith.constant 0.000000e+00 : f32
    %0 = vector.broadcast %cst : f32 to vector<8x128xf32>
    %c0 = arith.constant 0 : index
    %c0_0 = arith.constant 0 : index
    %1 = vector.load %arg1[%c0, %c0_0] : memref<8x1024xf32, #tpu.memory_space<vmem>>, vector<8x256xf32>
    %c0_1 = arith.constant 0 : index
    %c0_2 = arith.constant 0 : index
    %c0_3 = arith.constant 0 : index
    %2 = vector.load %arg2[%c0_1, %c0_2, %c0_3] : memref<4x256x128xf32, #tpu.memory_space<vmem>>, vector<1x256x128xf32>
    %3 = vector.shape_cast %2 : vector<1x256x128xf32> to vector<256x128xf32>
    %cst_4 = arith.constant dense<0.000000e+00> : vector<8x128xf32>
    %4 = tpu.matmul %1, %3, %cst_4 {dimension_numbers = #tpu.dot_dimension_numbers<[1], [0], [0], [1], [0, 0, 1, 1], [], []>} : vector<8x256xf32>, vector<256x128xf32>, vector<8x128xf32> -> vector<8x128xf32>
    %c0_5 = arith.constant 0 : index
    %c0_6 = arith.constant 0 : index
    %c0_7 = arith.constant 0 : index
    %5 = vector.load %arg3[%c0_5, %c0_6, %c0_7] : memref<4x1x128xf32, #tpu.memory_space<vmem>>, vector<1x1x128xf32>
    %6 = vector.shape_cast %5 : vector<1x1x128xf32> to vector<1x128xf32>
    %7 = vector.broadcast %6 : vector<1x128xf32> to vector<8x128xf32>
    %8 = arith.addf %4, %7 : vector<8x128xf32>
    %cst_8 = arith.constant 0.000000e+00 : f32
    %9 = vector.broadcast %cst_8 : f32 to vector<8x128xf32>
    %10 = arith.maximumf %8, %9 : vector<8x128xf32>
    %c0_9 = arith.constant 0 : index
    %c0_10 = arith.constant 0 : index
    %c0_11 = arith.constant 0 : index
    %11 = vector.load %arg4[%c0_9, %c0_10, %c0_11] : memref<4x128x128xf32, #tpu.memory_space<vmem>>, vector<1x128x128xf32>
    %12 = vector.shape_cast %11 : vector<1x128x128xf32> to vector<128x128xf32>
    %cst_12 = arith.constant dense<0.000000e+00> : vector<8x128xf32>
    %13 = tpu.matmul %10, %12, %cst_12 {dimension_numbers = #tpu.dot_dimension_numbers<[1], [0], [0], [1], [0, 0, 1, 1], [], []>} : vector<8x128xf32>, vector<128x128xf32>, vector<8x128xf32> -> vector<8x128xf32>
    %c0_13 = arith.constant 0 : index
    %c0_14 = arith.constant 0 : index
    %c0_15 = arith.constant 0 : index
    %14 = vector.load %arg5[%c0_13, %c0_14, %c0_15] : memref<4x1x128xf32, #tpu.memory_space<vmem>>, vector<1x1x128xf32>
    %15 = vector.shape_cast %14 : vector<1x1x128xf32> to vector<1x128xf32>
    %16 = vector.broadcast %15 : vector<1x128xf32> to vector<8x128xf32>
    %17 = arith.addf %13, %16 : vector<8x128xf32>
    %cst_16 = arith.constant dense<0xFF800000> : vector<8xf32>
    %18 = vector.multi_reduction <maximumf>, %17, %cst_16 [1] : vector<8x128xf32> to vector<8xf32>
    %19 = vector.shape_cast %18 : vector<8xf32> to vector<8x1xf32>
    %20 = vector.broadcast %19 : vector<8x1xf32> to vector<8x128xf32>
    %21 = arith.subf %17, %20 : vector<8x128xf32>
    %22 = math.exp %21 : vector<8x128xf32>
    %cst_17 = arith.constant dense<0.000000e+00> : vector<8xf32>
    %23 = vector.multi_reduction <add>, %22, %cst_17 [1] : vector<8x128xf32> to vector<8xf32>
    %24 = vector.shape_cast %23 : vector<8xf32> to vector<8x1xf32>
    %cst_18 = arith.constant 4.000000e+00 : f32
    %25 = vector.broadcast %cst_18 : f32 to vector<8x1xf32>
    %26 = arith.mulf %24, %25 : vector<8x1xf32>
    %cst_19 = arith.constant 1.000000e+00 : f32
    %27 = vector.broadcast %cst_19 : f32 to vector<8x1xf32>
    %28 = arith.divf %27, %26 : vector<8x1xf32>
    %29 = vector.broadcast %28 : vector<8x1xf32> to vector<8x128xf32>
    %30 = arith.mulf %22, %29 : vector<8x128xf32>
    %31 = arith.addf %0, %30 : vector<8x128xf32>
    %c0_20 = arith.constant 0 : index
    %c256 = arith.constant 256 : index
    %32 = vector.load %arg1[%c0_20, %c256] : memref<8x1024xf32, #tpu.memory_space<vmem>>, vector<8x256xf32>
    %c1 = arith.constant 1 : index
    %c0_21 = arith.constant 0 : index
    %c0_22 = arith.constant 0 : index
    %33 = vector.load %arg2[%c1, %c0_21, %c0_22] : memref<4x256x128xf32, #tpu.memory_space<vmem>>, vector<1x256x128xf32>
    %34 = vector.shape_cast %33 : vector<1x256x128xf32> to vector<256x128xf32>
    %cst_23 = arith.constant dense<0.000000e+00> : vector<8x128xf32>
    %35 = tpu.matmul %32, %34, %cst_23 {dimension_numbers = #tpu.dot_dimension_numbers<[1], [0], [0], [1], [0, 0, 1, 1], [], []>} : vector<8x256xf32>, vector<256x128xf32>, vector<8x128xf32> -> vector<8x128xf32>
    %c1_24 = arith.constant 1 : index
    %c0_25 = arith.constant 0 : index
    %c0_26 = arith.constant 0 : index
    %36 = vector.load %arg3[%c1_24, %c0_25, %c0_26] : memref<4x1x128xf32, #tpu.memory_space<vmem>>, vector<1x1x128xf32>
    %37 = vector.shape_cast %36 : vector<1x1x128xf32> to vector<1x128xf32>
    %38 = vector.broadcast %37 : vector<1x128xf32> to vector<8x128xf32>
    %39 = arith.addf %35, %38 : vector<8x128xf32>
    %cst_27 = arith.constant 0.000000e+00 : f32
    %40 = vector.broadcast %cst_27 : f32 to vector<8x128xf32>
    %41 = arith.maximumf %39, %40 : vector<8x128xf32>
    %c1_28 = arith.constant 1 : index
    %c0_29 = arith.constant 0 : index
    %c0_30 = arith.constant 0 : index
    %42 = vector.load %arg4[%c1_28, %c0_29, %c0_30] : memref<4x128x128xf32, #tpu.memory_space<vmem>>, vector<1x128x128xf32>
    %43 = vector.shape_cast %42 : vector<1x128x128xf32> to vector<128x128xf32>
    %cst_31 = arith.constant dense<0.000000e+00> : vector<8x128xf32>
    %44 = tpu.matmul %41, %43, %cst_31 {dimension_numbers = #tpu.dot_dimension_numbers<[1], [0], [0], [1], [0, 0, 1, 1], [], []>} : vector<8x128xf32>, vector<128x128xf32>, vector<8x128xf32> -> vector<8x128xf32>
    %c1_32 = arith.constant 1 : index
    %c0_33 = arith.constant 0 : index
    %c0_34 = arith.constant 0 : index
    %45 = vector.load %arg5[%c1_32, %c0_33, %c0_34] : memref<4x1x128xf32, #tpu.memory_space<vmem>>, vector<1x1x128xf32>
    %46 = vector.shape_cast %45 : vector<1x1x128xf32> to vector<1x128xf32>
    %47 = vector.broadcast %46 : vector<1x128xf32> to vector<8x128xf32>
    %48 = arith.addf %44, %47 : vector<8x128xf32>
    %cst_35 = arith.constant dense<0xFF800000> : vector<8xf32>
    %49 = vector.multi_reduction <maximumf>, %48, %cst_35 [1] : vector<8x128xf32> to vector<8xf32>
    %50 = vector.shape_cast %49 : vector<8xf32> to vector<8x1xf32>
    %51 = vector.broadcast %50 : vector<8x1xf32> to vector<8x128xf32>
    %52 = arith.subf %48, %51 : vector<8x128xf32>
    %53 = math.exp %52 : vector<8x128xf32>
    %cst_36 = arith.constant dense<0.000000e+00> : vector<8xf32>
    %54 = vector.multi_reduction <add>, %53, %cst_36 [1] : vector<8x128xf32> to vector<8xf32>
    %55 = vector.shape_cast %54 : vector<8xf32> to vector<8x1xf32>
    %cst_37 = arith.constant 4.000000e+00 : f32
    %56 = vector.broadcast %cst_37 : f32 to vector<8x1xf32>
    %57 = arith.mulf %55, %56 : vector<8x1xf32>
    %cst_38 = arith.constant 1.000000e+00 : f32
    %58 = vector.broadcast %cst_38 : f32 to vector<8x1xf32>
    %59 = arith.divf %58, %57 : vector<8x1xf32>
    %60 = vector.broadcast %59 : vector<8x1xf32> to vector<8x128xf32>
    %61 = arith.mulf %53, %60 : vector<8x128xf32>
    %62 = arith.addf %31, %61 : vector<8x128xf32>
    %c0_39 = arith.constant 0 : index
    %c512 = arith.constant 512 : index
    %63 = vector.load %arg1[%c0_39, %c512] : memref<8x1024xf32, #tpu.memory_space<vmem>>, vector<8x256xf32>
    %c2 = arith.constant 2 : index
    %c0_40 = arith.constant 0 : index
    %c0_41 = arith.constant 0 : index
    %64 = vector.load %arg2[%c2, %c0_40, %c0_41] : memref<4x256x128xf32, #tpu.memory_space<vmem>>, vector<1x256x128xf32>
    %65 = vector.shape_cast %64 : vector<1x256x128xf32> to vector<256x128xf32>
    %cst_42 = arith.constant dense<0.000000e+00> : vector<8x128xf32>
    %66 = tpu.matmul %63, %65, %cst_42 {dimension_numbers = #tpu.dot_dimension_numbers<[1], [0], [0], [1], [0, 0, 1, 1], [], []>} : vector<8x256xf32>, vector<256x128xf32>, vector<8x128xf32> -> vector<8x128xf32>
    %c2_43 = arith.constant 2 : index
    %c0_44 = arith.constant 0 : index
    %c0_45 = arith.constant 0 : index
    %67 = vector.load %arg3[%c2_43, %c0_44, %c0_45] : memref<4x1x128xf32, #tpu.memory_space<vmem>>, vector<1x1x128xf32>
    %68 = vector.shape_cast %67 : vector<1x1x128xf32> to vector<1x128xf32>
    %69 = vector.broadcast %68 : vector<1x128xf32> to vector<8x128xf32>
    %70 = arith.addf %66, %69 : vector<8x128xf32>
    %cst_46 = arith.constant 0.000000e+00 : f32
    %71 = vector.broadcast %cst_46 : f32 to vector<8x128xf32>
    %72 = arith.maximumf %70, %71 : vector<8x128xf32>
    %c2_47 = arith.constant 2 : index
    %c0_48 = arith.constant 0 : index
    %c0_49 = arith.constant 0 : index
    %73 = vector.load %arg4[%c2_47, %c0_48, %c0_49] : memref<4x128x128xf32, #tpu.memory_space<vmem>>, vector<1x128x128xf32>
    %74 = vector.shape_cast %73 : vector<1x128x128xf32> to vector<128x128xf32>
    %cst_50 = arith.constant dense<0.000000e+00> : vector<8x128xf32>
    %75 = tpu.matmul %72, %74, %cst_50 {dimension_numbers = #tpu.dot_dimension_numbers<[1], [0], [0], [1], [0, 0, 1, 1], [], []>} : vector<8x128xf32>, vector<128x128xf32>, vector<8x128xf32> -> vector<8x128xf32>
    %c2_51 = arith.constant 2 : index
    %c0_52 = arith.constant 0 : index
    %c0_53 = arith.constant 0 : index
    %76 = vector.load %arg5[%c2_51, %c0_52, %c0_53] : memref<4x1x128xf32, #tpu.memory_space<vmem>>, vector<1x1x128xf32>
    %77 = vector.shape_cast %76 : vector<1x1x128xf32> to vector<1x128xf32>
    %78 = vector.broadcast %77 : vector<1x128xf32> to vector<8x128xf32>
    %79 = arith.addf %75, %78 : vector<8x128xf32>
    %cst_54 = arith.constant dense<0xFF800000> : vector<8xf32>
    %80 = vector.multi_reduction <maximumf>, %79, %cst_54 [1] : vector<8x128xf32> to vector<8xf32>
    %81 = vector.shape_cast %80 : vector<8xf32> to vector<8x1xf32>
    %82 = vector.broadcast %81 : vector<8x1xf32> to vector<8x128xf32>
    %83 = arith.subf %79, %82 : vector<8x128xf32>
    %84 = math.exp %83 : vector<8x128xf32>
    %cst_55 = arith.constant dense<0.000000e+00> : vector<8xf32>
    %85 = vector.multi_reduction <add>, %84, %cst_55 [1] : vector<8x128xf32> to vector<8xf32>
    %86 = vector.shape_cast %85 : vector<8xf32> to vector<8x1xf32>
    %cst_56 = arith.constant 4.000000e+00 : f32
    %87 = vector.broadcast %cst_56 : f32 to vector<8x1xf32>
    %88 = arith.mulf %86, %87 : vector<8x1xf32>
    %cst_57 = arith.constant 1.000000e+00 : f32
    %89 = vector.broadcast %cst_57 : f32 to vector<8x1xf32>
    %90 = arith.divf %89, %88 : vector<8x1xf32>
    %91 = vector.broadcast %90 : vector<8x1xf32> to vector<8x128xf32>
    %92 = arith.mulf %84, %91 : vector<8x128xf32>
    %93 = arith.addf %62, %92 : vector<8x128xf32>
    %c0_58 = arith.constant 0 : index
    %c768 = arith.constant 768 : index
    %94 = vector.load %arg1[%c0_58, %c768] : memref<8x1024xf32, #tpu.memory_space<vmem>>, vector<8x256xf32>
    %c3 = arith.constant 3 : index
    %c0_59 = arith.constant 0 : index
    %c0_60 = arith.constant 0 : index
    %95 = vector.load %arg2[%c3, %c0_59, %c0_60] : memref<4x256x128xf32, #tpu.memory_space<vmem>>, vector<1x256x128xf32>
    %96 = vector.shape_cast %95 : vector<1x256x128xf32> to vector<256x128xf32>
    %cst_61 = arith.constant dense<0.000000e+00> : vector<8x128xf32>
    %97 = tpu.matmul %94, %96, %cst_61 {dimension_numbers = #tpu.dot_dimension_numbers<[1], [0], [0], [1], [0, 0, 1, 1], [], []>} : vector<8x256xf32>, vector<256x128xf32>, vector<8x128xf32> -> vector<8x128xf32>
    %c3_62 = arith.constant 3 : index
    %c0_63 = arith.constant 0 : index
    %c0_64 = arith.constant 0 : index
    %98 = vector.load %arg3[%c3_62, %c0_63, %c0_64] : memref<4x1x128xf32, #tpu.memory_space<vmem>>, vector<1x1x128xf32>
    %99 = vector.shape_cast %98 : vector<1x1x128xf32> to vector<1x128xf32>
    %100 = vector.broadcast %99 : vector<1x128xf32> to vector<8x128xf32>
    %101 = arith.addf %97, %100 : vector<8x128xf32>
    %cst_65 = arith.constant 0.000000e+00 : f32
    %102 = vector.broadcast %cst_65 : f32 to vector<8x128xf32>
    %103 = arith.maximumf %101, %102 : vector<8x128xf32>
    %c3_66 = arith.constant 3 : index
    %c0_67 = arith.constant 0 : index
    %c0_68 = arith.constant 0 : index
    %104 = vector.load %arg4[%c3_66, %c0_67, %c0_68] : memref<4x128x128xf32, #tpu.memory_space<vmem>>, vector<1x128x128xf32>
    %105 = vector.shape_cast %104 : vector<1x128x128xf32> to vector<128x128xf32>
    %cst_69 = arith.constant dense<0.000000e+00> : vector<8x128xf32>
    %106 = tpu.matmul %103, %105, %cst_69 {dimension_numbers = #tpu.dot_dimension_numbers<[1], [0], [0], [1], [0, 0, 1, 1], [], []>} : vector<8x128xf32>, vector<128x128xf32>, vector<8x128xf32> -> vector<8x128xf32>
    %c3_70 = arith.constant 3 : index
    %c0_71 = arith.constant 0 : index
    %c0_72 = arith.constant 0 : index
    %107 = vector.load %arg5[%c3_70, %c0_71, %c0_72] : memref<4x1x128xf32, #tpu.memory_space<vmem>>, vector<1x1x128xf32>
    %108 = vector.shape_cast %107 : vector<1x1x128xf32> to vector<1x128xf32>
    %109 = vector.broadcast %108 : vector<1x128xf32> to vector<8x128xf32>
    %110 = arith.addf %106, %109 : vector<8x128xf32>
    %cst_73 = arith.constant dense<0xFF800000> : vector<8xf32>
    %111 = vector.multi_reduction <maximumf>, %110, %cst_73 [1] : vector<8x128xf32> to vector<8xf32>
    %112 = vector.shape_cast %111 : vector<8xf32> to vector<8x1xf32>
    %113 = vector.broadcast %112 : vector<8x1xf32> to vector<8x128xf32>
    %114 = arith.subf %110, %113 : vector<8x128xf32>
    %115 = math.exp %114 : vector<8x128xf32>
    %cst_74 = arith.constant dense<0.000000e+00> : vector<8xf32>
    %116 = vector.multi_reduction <add>, %115, %cst_74 [1] : vector<8x128xf32> to vector<8xf32>
    %117 = vector.shape_cast %116 : vector<8xf32> to vector<8x1xf32>
    %cst_75 = arith.constant 4.000000e+00 : f32
    %118 = vector.broadcast %cst_75 : f32 to vector<8x1xf32>
    %119 = arith.mulf %117, %118 : vector<8x1xf32>
    %cst_76 = arith.constant 1.000000e+00 : f32
    %120 = vector.broadcast %cst_76 : f32 to vector<8x1xf32>
    %121 = arith.divf %120, %119 : vector<8x1xf32>
    %122 = vector.broadcast %121 : vector<8x1xf32> to vector<8x128xf32>
    %123 = arith.mulf %115, %122 : vector<8x128xf32>
    %124 = arith.addf %93, %123 : vector<8x128xf32>
    %c0_77 = arith.constant 0 : index
    %c0_78 = arith.constant 0 : index
    %125 = vector.load %arg6[%c0_77, %c0_78] : memref<8x128xf32, #tpu.memory_space<vmem>>, vector<8x128xf32>
    tpu.vector_store %arg6[%c0_77, %c0_78], %124 {strides = array<i32>} : memref<8x128xf32, #tpu.memory_space<vmem>>, vector<8x128xf32>,
    return
  }
  func.func @transform_0(%arg0: i32) -> (i32, i32) {
    %c0_i32 = arith.constant 0 : i32
    %c0_i32_0 = arith.constant 0 : i32
    return %arg0, %c0_i32 : i32, i32
  }
  func.func @transform_1(%arg0: i32) -> (i32, i32, i32) {
    %c0_i32 = arith.constant 0 : i32
    %c0_i32_0 = arith.constant 0 : i32
    %c0_i32_1 = arith.constant 0 : i32
    %c0_i32_2 = arith.constant 0 : i32
    return %c0_i32, %c0_i32_0, %c0_i32_1 : i32, i32, i32
  }
  func.func @transform_2(%arg0: i32) -> (i32, i32, i32) {
    %c0_i32 = arith.constant 0 : i32
    %c0_i32_0 = arith.constant 0 : i32
    %c0_i32_1 = arith.constant 0 : i32
    %c0_i32_2 = arith.constant 0 : i32
    return %c0_i32, %c0_i32_0, %c0_i32_1 : i32, i32, i32
  }
  func.func @transform_3(%arg0: i32) -> (i32, i32, i32) {
    %c0_i32 = arith.constant 0 : i32
    %c0_i32_0 = arith.constant 0 : i32
    %c0_i32_1 = arith.constant 0 : i32
    %c0_i32_2 = arith.constant 0 : i32
    return %c0_i32, %c0_i32_0, %c0_i32_1 : i32, i32, i32
  }
  func.func @transform_4(%arg0: i32) -> (i32, i32, i32) {
    %c0_i32 = arith.constant 0 : i32
    %c0_i32_0 = arith.constant 0 : i32
    %c0_i32_1 = arith.constant 0 : i32
    %c0_i32_2 = arith.constant 0 : i32
    return %c0_i32, %c0_i32_0, %c0_i32_1 : i32, i32, i32
  }
  func.func @transform_5(%arg0: i32) -> (i32, i32) {
    %c0_i32 = arith.constant 0 : i32
    %c0_i32_0 = arith.constant 0 : i32
    return %arg0, %c0_i32 : i32, i32
  }
}

</mosaic_0001>

<bundles_post_ra>
// kernel: experts_avg.1
= control target key start
LH: loop header
LB: loop body
LE: loop exit
PB: predicated region body
PF: predicated region fallthrough
CT: control target
= control target key end

     0   :  { %s1513_s0 = inlined_call_operand.vmem [shape: f32[8,1024], index: 0, kind: input, shape index: {}]   ;;  %s1514_s1 = inlined_call_operand.vmem [shape: f32[4,256,128], index: 1, kind: input, shape index: {}]   ;;  %s1515_s2 = inlined_call_operand.vmem [shape: f32[4,1,128], index: 2, kind: input, shape index: {}]   ;;  %s1516_s3 = inlined_call_operand.vmem [shape: f32[4,128,128], index: 3, kind: input, shape index: {}]   ;;  %s1517_s4 = inlined_call_operand.vmem [shape: f32[4,1,128], index: 4, kind: input, shape index: {}]   ;;  %s1518_s5 = inlined_call_operand.hbm [shape: f32[8,128], index: 5, kind: output, shape index: {}]  }
   0x1   :  { %v38_v0 = vld [vmem:[%s1514_s1 + $0x78] sm:$0xff]  ;;  %v37_v1 = vld [vmem:[%s1514_s1 + $0x70] sm:$0xff]  ;;  %v36_v4 = vld [vmem:[%s1514_s1 + $0x68] sm:$0xff] }
   0x2   :  { %v54_v2 = vld [vmem:[%s1514_s1 + $0xf8] sm:$0xff]  ;;  %59 = vmatpush.msra.mxu0 %v38_v0  ;;  %v53_v3 = vld [vmem:[%s1514_s1 + $0xf0] sm:$0xff]  ;;  %v52_v5 = vld [vmem:[%s1514_s1 + $0xe8] sm:$0xff] }
   0x3   :  { %79 = vmatpush.msra.mxu1 %v54_v2  ;;  %v35_v6 = vld [vmem:[%s1514_s1 + $0x60] sm:$0xff]  ;;  %v34_v8 = vld [vmem:[%s1514_s1 + $0x58] sm:$0xff]  ;;  %v33_v11 = vld [vmem:[%s1514_s1 + $0x50] sm:$0xff] }
   0x4   :  { %60 = vmatpush.msra.mxu0 %v37_v1  ;;  %v51_v7 = vld [vmem:[%s1514_s1 + $0xe0] sm:$0xff]  ;;  %v50_v9 = vld [vmem:[%s1514_s1 + $0xd8] sm:$0xff]  ;;  %v49_v12 = vld [vmem:[%s1514_s1 + $0xd0] sm:$0xff] }
   0x5   :  { %80 = vmatpush.msra.mxu1 %v53_v3  ;;  %v641_v10 = vld [vmem:[%s1514_s1 + $0x178] sm:$0xff]  ;;  %v640_v13 = vld [vmem:[%s1514_s1 + $0x170] sm:$0xff]  ;;  %v639_v14 = vld [vmem:[%s1514_s1 + $0x168] sm:$0xff] }
   0x6   :  { %61 = vmatpush.msra.mxu0 %v36_v4  ;;  %205 = vmatpush.msra.mxu3 %v641_v10  ;;  %v32_v15 = vld [vmem:[%s1514_s1 + $0x48] sm:$0xff]  ;;  %v638_v17 = vld [vmem:[%s1514_s1 + $0x160] sm:$0xff]  ;;  %v637_v20 = vld [vmem:[%s1514_s1 + $0x158] sm:$0xff] }
   0x7   :  { %81 = vmatpush.msra.mxu1 %v52_v5  ;;  %v48_v16 = vld [vmem:[%s1514_s1 + $0xc8] sm:$0xff]  ;;  %v31_v18 = vld [vmem:[%s1514_s1 + $0x40] sm:$0xff]  ;;  %v30_v21 = vld [vmem:[%s1514_s1 + $0x38] sm:$0xff] }
   0x8   :  { %62 = vmatpush.msra.mxu0 %v35_v6  ;;  %206 = vmatpush.msra.mxu3 %v640_v13  ;;  %v47_v19 = vld [vmem:[%s1514_s1 + $0xc0] sm:$0xff]  ;;  %v46_v22 = vld [vmem:[%s1514_s1 + $0xb8] sm:$0xff]  ;;  %v636_v23 = vld [vmem:[%s1514_s1 + $0x150] sm:$0xff] }
   0x9   :  { %82 = vmatpush.msra.mxu1 %v51_v7  ;;  %v29_v24 = vld [vmem:[%s1514_s1 + $0x30] sm:$0xff]  ;;  %v635_v26 = vld [vmem:[%s1514_s1 + $0x148] sm:$0xff]  ;;  %v27_v29 = vld [vmem:[%s1514_s1 + $0x20] sm:$0xff] }
   0xa   :  { %63 = vmatpush.msra.mxu0 %v34_v8  ;;  %207 = vmatpush.msra.mxu3 %v639_v14  ;;  %v45_v25 = vld [vmem:[%s1514_s1 + $0xb0] sm:$0xff]  ;;  %v28_v27 = vld [vmem:[%s1514_s1 + $0x28] sm:$0xff]  ;;  %v43_v30 = vld [vmem:[%s1514_s1 + $0xa0] sm:$0xff] }
   0xb   :  { %83 = vmatpush.msra.mxu1 %v50_v9  ;;  %v44_v28 = vld [vmem:[%s1514_s1 + $0xa8] sm:$0xff]  ;;  %v634_v31 = vld [vmem:[%s1514_s1 + $0x140] sm:$0xff]  ;;  %v26_v32 = vld [vmem:[%s1514_s1 + $0x18] sm:$0xff] }
   0xc   :  { %64 = vmatpush.msra.mxu0 %v33_v11  ;;  %208 = vmatpush.msra.mxu3 %v638_v17  ;;  %v42_v33 = vld [vmem:[%s1514_s1 + $0x98] sm:$0xff]  ;;  %v632_v35 = vld [vmem:[%s1514_s1 + $0x130] sm:$0xff] }
   0xd   :  { %84 = vmatpush.msra.mxu1 %v49_v12  ;;  %v633_v34 = vld [vmem:[%s1514_s1 + $0x138] sm:$0xff]  ;;  %v25_v36 = vld [vmem:[%s1514_s1 + $0x10] sm:$0xff] }
   0xe   :  { %65 = vmatpush.msra.mxu0 %v32_v15  ;;  %209 = vmatpush.msra.mxu3 %v637_v20  ;;  %v41_v37 = vld [vmem:[%s1514_s1 + $0x90] sm:$0xff] }
   0xf   :  { %85 = vmatpush.msra.mxu1 %v48_v16 }
  0x10   :  { %66 = vmatpush.msra.mxu0 %v31_v18  ;;  %210 = vmatpush.msra.mxu3 %v636_v23 }
  0x11   :  { %86 = vmatpush.msra.mxu1 %v47_v19 }
  0x12   :  { %67 = vmatpush.msra.mxu0 %v30_v21  ;;  %211 = vmatpush.msra.mxu3 %v635_v26 }
  0x13   :  { %87 = vmatpush.msra.mxu1 %v46_v22 }
  0x14   :  { %68 = vmatpush.msra.mxu0 %v29_v24  ;;  %212 = vmatpush.msra.mxu3 %v634_v31 }
  0x15   :  { %88 = vmatpush.msra.mxu1 %v45_v25 }
  0x16   :  { %69 = vmatpush.msra.mxu0 %v28_v27  ;;  %213 = vmatpush.msra.mxu3 %v633_v34 }
  0x17   :  { %89 = vmatpush.msra.mxu1 %v44_v28 }
  0x18   :  { %70 = vmatpush.msra.mxu0 %v27_v29 }
  0x19   :  { %90 = vmatpush.msra.mxu1 %v43_v30 }
  0x1a   :  { %10 = vsyncpa [#allocation3], 0  ;;  %71 = vmatpush.msra.mxu0 %v26_v32  ;;  %v631_v38 = vld [vmem:[%s1514_s1 + $0x128] sm:$0xff]  ;;  %214 = vmatpush.msra.mxu3 %v632_v35  ;;  %v630_v41 = vld [vmem:[%s1514_s1 + $0x120] sm:$0xff]  ;;  %s617_s30 = sshll.u32 %s1518_s5, 4  ;;  %s618_s30 = int_to_ptr.hbm [resolvable:$true] %s617_s30 }
  0x1b   :  { %91 = vmatpush.msra.mxu1 %v42_v33  ;;  %v24_v39 = vld [vmem:[%s1514_s1 + $0x8] sm:$0xff]  ;;  %v23_v42 = vld [vmem:[%s1514_s1] sm:$0xff]  ;;  %v657_v46 = vld [vmem:[%s1514_s1 + $0x1f8] sm:$0xff] }
  0x1c   :  { %v40_v40 = vld [vmem:[%s1514_s1 + $0x88] sm:$0xff]  ;;  %72 = vmatpush.msra.mxu0 %v25_v36  ;;  %v39_v43 = vld [vmem:[%s1514_s1 + $0x80] sm:$0xff]  ;;  %215 = vmatpush.msra.mxu3 %v631_v38  ;;  %v629_v47 = vld [vmem:[%s1514_s1 + $0x118] sm:$0xff] }
  0x1d   :  { %92 = vmatpush.msra.mxu1 %v41_v37  ;;  %v21_v44 = vld [vmem:[%s1513_s0] sm:$0xff]  ;;  %v22_v45 = vld [vmem:[%s1513_s0 + $0x8] sm:$0xff]  ;;  %v656_v48 = vld [vmem:[%s1514_s1 + $0x1f0] sm:$0xff] }
  0x1e   :  { %73 = vmatpush.msra.mxu0 %v24_v39  ;;  %216 = vmatpush.msra.mxu3 %v630_v41  ;;  %v628_v49 = vld [vmem:[%s1514_s1 + $0x110] sm:$0xff]  ;;  %v115_v50 = vld [vmem:[%s1516_s3 + $0x78] sm:$0xff]  ;;  %v655_v52 = vld [vmem:[%s1514_s1 + $0x1e8] sm:$0xff] }
  0x1f   :  { %93 = vmatpush.msra.mxu1 %v40_v40  ;;  %v114_v51 = vld [vmem:[%s1516_s3 + $0x70] sm:$0xff]  ;;  %v627_v53 = vld [vmem:[%s1514_s1 + $0x108] sm:$0xff]  ;;  %120 = vmatpush.msra.mxu2 %v115_v50  ;;  %v654_v55 = vld [vmem:[%s1514_s1 + $0x1e0] sm:$0xff] }
  0x20   :  { %74 = vmatpush.msra.mxu0 %v23_v42  ;;  %217 = vmatpush.msra.mxu3 %v629_v47  ;;  %v113_v54 = vld [vmem:[%s1516_s3 + $0x68] sm:$0xff]  ;;  %v626_v56 = vld [vmem:[%s1514_s1 + $0x100] sm:$0xff]  ;;  %v165_v57 = vld [vmem:[%s1513_s0 + $0x10] sm:$0xff] }
  0x21   :  { %94 = vmatpush.msra.mxu1 %v39_v43  ;;  %75 = vmatmul.f32.vlgmr.msra.gmra.mxu0 %v21_v44  ;;  %v112_v58 = vld [vmem:[%s1516_s3 + $0x60] sm:$0xff]  ;;  %v653_v59 = vld [vmem:[%s1514_s1 + $0x1d8] sm:$0xff]  ;;  %v652_v62 = vld [vmem:[%s1514_s1 + $0x1d0] sm:$0xff] }
  0x22   :  { %95 = vmatmul.f32.vlgmr.msra.gmra.mxu1 %v22_v45  ;;  %225 = vmatpush.msrb.mxu0 %v657_v46  ;;  %v674_v60 = vld [vmem:[%s1516_s3 + $0xf8] sm:$0xff]  ;;  %v673_v63 = vld [vmem:[%s1516_s3 + $0xf0] sm:$0xff]  ;;  %v651_v2 = vld [vmem:[%s1514_s1 + $0x1c8] sm:$0xff] }
  0x23   :  { %218 = vmatpush.msra.mxu3 %v628_v49  ;;  %121 = vmatpush.msra.mxu2 %v114_v51  ;;  %v111_v61 = vld [vmem:[%s1516_s3 + $0x58] sm:$0xff]  ;;  %v110_v0 = vld [vmem:[%s1516_s3 + $0x50] sm:$0xff]  ;;  %v672_v3 = vld [vmem:[%s1516_s3 + $0xe8] sm:$0xff] }
  0x24   :  { %226 = vmatpush.msrb.mxu0 %v656_v48  ;;  %268 = vmatpush.msrb.mxu1 %v674_v60  ;;  %v707_v1 = vld [vmem:[%s1514_s1 + $0x2f8] sm:$0xff]  ;;  %v109_v4 = vld [vmem:[%s1516_s3 + $0x48] sm:$0xff]  ;;  %v706_v5 = vld [vmem:[%s1514_s1 + $0x2f0] sm:$0xff] }
  0x25   :  { %219 = vmatpush.msra.mxu3 %v627_v53  ;;  %122 = vmatpush.msra.mxu2 %v113_v54  ;;  %v650_v6 = vld [vmem:[%s1514_s1 + $0x1c0] sm:$0xff]  ;;  %v705_v9 = vld [vmem:[%s1514_s1 + $0x2e8] sm:$0xff]  ;;  %v649_v10 = vld [vmem:[%s1514_s1 + $0x1b8] sm:$0xff] }
  0x26   :  { %227 = vmatpush.msrb.mxu0 %v655_v52  ;;  %269 = vmatpush.msrb.mxu1 %v673_v63  ;;  %v671_v7 = vld [vmem:[%s1516_s3 + $0xe0] sm:$0xff]  ;;  %v670_v11 = vld [vmem:[%s1516_s3 + $0xd8] sm:$0xff]  ;;  %v648_v14 = vld [vmem:[%s1514_s1 + $0x1b0] sm:$0xff] }
  0x27   :  { %220 = vmatpush.msra.mxu3 %v626_v56  ;;  %123 = vmatpush.msra.mxu2 %v112_v58  ;;  %v108_v8 = vld [vmem:[%s1516_s3 + $0x40] sm:$0xff]  ;;  %v107_v12 = vld [vmem:[%s1516_s3 + $0x38] sm:$0xff]  ;;  %v669_v15 = vld [vmem:[%s1516_s3 + $0xd0] sm:$0xff] }
  0x28   :  { %228 = vmatpush.msrb.mxu0 %v654_v55  ;;  %221 = vmatmul.f32.vlgmr.msra.gmra.mxu3 %v165_v57  ;;  %v704_v13 = vld [vmem:[%s1514_s1 + $0x2e0] sm:$0xff]  ;;  %v106_v16 = vld [vmem:[%s1516_s3 + $0x30] sm:$0xff]  ;;  %v703_v17 = vld [vmem:[%s1514_s1 + $0x2d8] sm:$0xff] }
  0x29   :  { %124 = vmatpush.msra.mxu2 %v111_v61  ;;  %373 = vmatpush.msrb.mxu3 %v707_v1  ;;  %v647_v18 = vld [vmem:[%s1514_s1 + $0x1a8] sm:$0xff]  ;;  %v702_v21 = vld [vmem:[%s1514_s1 + $0x2d0] sm:$0xff]  ;;  %v646_v22 = vld [vmem:[%s1514_s1 + $0x1a0] sm:$0xff] }
  0x2a   :  { %229 = vmatpush.msrb.mxu0 %v653_v59  ;;  %270 = vmatpush.msrb.mxu1 %v672_v3  ;;  %v668_v19 = vld [vmem:[%s1516_s3 + $0xc8] sm:$0xff]  ;;  %v667_v23 = vld [vmem:[%s1516_s3 + $0xc0] sm:$0xff]  ;;  %v645_v26 = vld [vmem:[%s1514_s1 + $0x198] sm:$0xff] }
  0x2b   :  { %125 = vmatpush.msra.mxu2 %v110_v0  ;;  %374 = vmatpush.msrb.mxu3 %v706_v5  ;;  %v105_v20 = vld [vmem:[%s1516_s3 + $0x28] sm:$0xff]  ;;  %v104_v24 = vld [vmem:[%s1516_s3 + $0x20] sm:$0xff]  ;;  %v666_v27 = vld [vmem:[%s1516_s3 + $0xb8] sm:$0xff] }
  0x2c   :  { %230 = vmatpush.msrb.mxu0 %v652_v62  ;;  %271 = vmatpush.msrb.mxu1 %v671_v7  ;;  %v701_v25 = vld [vmem:[%s1514_s1 + $0x2c8] sm:$0xff]  ;;  %v103_v28 = vld [vmem:[%s1516_s3 + $0x18] sm:$0xff]  ;;  %v644_v29 = vld [vmem:[%s1514_s1 + $0x190] sm:$0xff] }
  0x2d   :  { %126 = vmatpush.msra.mxu2 %v109_v4  ;;  %375 = vmatpush.msrb.mxu3 %v705_v9  ;;  %v102_v30 = vld [vmem:[%s1516_s3 + $0x10] sm:$0xff]  ;;  %v643_v31 = vld [vmem:[%s1514_s1 + $0x188] sm:$0xff]  ;;  %v642_v33 = vld [vmem:[%s1514_s1 + $0x180] sm:$0xff] }
  0x2e   :  { %231 = vmatpush.msrb.mxu0 %v651_v2  ;;  %272 = vmatpush.msrb.mxu1 %v670_v11  ;;  %v101_v32 = vld [vmem:[%s1516_s3 + $0x8] sm:$0xff]  ;;  %v166_v34 = vld [vmem:[%s1513_s0 + $0x18] sm:$0xff]  ;;  %v100_v35 = vld [vmem:[%s1516_s3] sm:$0xff] }
  0x2f   :  { %127 = vmatpush.msra.mxu2 %v108_v8  ;;  %376 = vmatpush.msrb.mxu3 %v704_v13  ;;  %v691_v36 = vld [vmem:[%s1514_s1 + $0x278] sm:$0xff]  ;;  %v690_v37 = vld [vmem:[%s1514_s1 + $0x270] sm:$0xff]  ;;  %v689_v38 = vld [vmem:[%s1514_s1 + $0x268] sm:$0xff] }
  0x30   :  { %232 = vmatpush.msrb.mxu0 %v650_v6  ;;  %273 = vmatpush.msrb.mxu1 %v669_v15  ;;  %v688_v39 = vld [vmem:[%s1514_s1 + $0x260] sm:$0xff]  ;;  %v687_v40 = vld [vmem:[%s1514_s1 + $0x258] sm:$0xff]  ;;  %v686_v41 = vld [vmem:[%s1514_s1 + $0x250] sm:$0xff] }
  0x31   :  { %128 = vmatpush.msra.mxu2 %v107_v12  ;;  %377 = vmatpush.msrb.mxu3 %v703_v17  ;;  %v685_v42 = vld [vmem:[%s1514_s1 + $0x248] sm:$0xff]  ;;  %v684_v43 = vld [vmem:[%s1514_s1 + $0x240] sm:$0xff]  ;;  %v683_v44 = vld [vmem:[%s1514_s1 + $0x238] sm:$0xff] }
  0x32   :  { %233 = vmatpush.msrb.mxu0 %v649_v10  ;;  %274 = vmatpush.msrb.mxu1 %v668_v19  ;;  %v682_v45 = vld [vmem:[%s1514_s1 + $0x230] sm:$0xff]  ;;  %v681_v46 = vld [vmem:[%s1514_s1 + $0x228] sm:$0xff]  ;;  %v680_v48 = vld [vmem:[%s1514_s1 + $0x220] sm:$0xff] }
  0x33   :  { %129 = vmatpush.msra.mxu2 %v106_v16  ;;  %378 = vmatpush.msrb.mxu3 %v702_v21  ;;  %v665_v47 = vld [vmem:[%s1516_s3 + $0xb0] sm:$0xff]  ;;  %v700_v49 = vld [vmem:[%s1514_s1 + $0x2c0] sm:$0xff]  ;;  %v664_v50 = vld [vmem:[%s1516_s3 + $0xa8] sm:$0xff] }
  0x34   :  { %234 = vmatpush.msrb.mxu0 %v648_v14  ;;  %275 = vmatpush.msrb.mxu1 %v667_v23  ;;  %v679_v51 = vld [vmem:[%s1514_s1 + $0x218] sm:$0xff]  ;;  %v663_v53 = vld [vmem:[%s1516_s3 + $0xa0] sm:$0xff]  ;;  %v678_v54 = vld [vmem:[%s1514_s1 + $0x210] sm:$0xff] }
  0x35   :  { %130 = vmatpush.msra.mxu2 %v105_v20  ;;  %379 = vmatpush.msrb.mxu3 %v701_v25  ;;  %v699_v52 = vld [vmem:[%s1514_s1 + $0x2b8] sm:$0xff]  ;;  %v698_v55 = vld [vmem:[%s1514_s1 + $0x2b0] sm:$0xff]  ;;  %v677_v57 = vld [vmem:[%s1514_s1 + $0x208] sm:$0xff] }
  0x36   :  { %235 = vmatpush.msrb.mxu0 %v647_v18  ;;  %276 = vmatpush.msrb.mxu1 %v666_v27  ;;  %v662_v56 = vld [vmem:[%s1516_s3 + $0x98] sm:$0xff]  ;;  %v697_v58 = vld [vmem:[%s1514_s1 + $0x2a8] sm:$0xff]  ;;  %v661_v59 = vld [vmem:[%s1516_s3 + $0x90] sm:$0xff] }
  0x37   :  { %131 = vmatpush.msra.mxu2 %v104_v24  ;;  %380 = vmatpush.msrb.mxu3 %v700_v49  ;;  %v676_v60 = vld [vmem:[%s1514_s1 + $0x200] sm:$0xff]  ;;  %v660_v62 = vld [vmem:[%s1516_s3 + $0x88] sm:$0xff]  ;;  %v695_v63 = vld [vmem:[%s1514_s1 + $0x298] sm:$0xff] }
  0x38   :  { %236 = vmatpush.msrb.mxu0 %v646_v22  ;;  %277 = vmatpush.msrb.mxu1 %v665_v47  ;;  %v696_v61 = vld [vmem:[%s1514_s1 + $0x2a0] sm:$0xff]  ;;  %v694_v1 = vld [vmem:[%s1514_s1 + $0x290] sm:$0xff]  ;;  %v741_v2 = vld [vmem:[%s1514_s1 + $0x378] sm:$0xff] }
  0x39   :  { %132 = vmatpush.msra.mxu2 %v103_v28  ;;  %381 = vmatpush.msrb.mxu3 %v699_v52  ;;  %v659_v0 = vld [vmem:[%s1516_s3 + $0x80] sm:$0xff]  ;;  %v693_v3 = vld [vmem:[%s1514_s1 + $0x288] sm:$0xff]  ;;  %v740_v4 = vld [vmem:[%s1514_s1 + $0x370] sm:$0xff] }
  0x3a   :  { %237 = vmatpush.msrb.mxu0 %v645_v26  ;;  %278 = vmatpush.msrb.mxu1 %v664_v50  ;;  %v692_v5 = vld [vmem:[%s1514_s1 + $0x280] sm:$0xff]  ;;  %v314_v6 = vld [vmem:[%s1513_s0 + $0x28] sm:$0xff]  ;;  %v737_v9 = vld [vmem:[%s1514_s1 + $0x358] sm:$0xff] }
  0x3b   :  { %133 = vmatpush.msra.mxu2 %v102_v30  ;;  %382 = vmatpush.msrb.mxu3 %v698_v55  ;;  %v739_v7 = vld [vmem:[%s1514_s1 + $0x368] sm:$0xff]  ;;  %v738_v8 = vld [vmem:[%s1514_s1 + $0x360] sm:$0xff]  ;;  %v736_v10 = vld [vmem:[%s1514_s1 + $0x350] sm:$0xff] }
  0x3c   :  { %238 = vmatpush.msrb.mxu0 %v644_v29  ;;  %279 = vmatpush.msrb.mxu1 %v663_v53  ;;  %v735_v11 = vld [vmem:[%s1514_s1 + $0x348] sm:$0xff]  ;;  %v734_v12 = vld [vmem:[%s1514_s1 + $0x340] sm:$0xff]  ;;  %v733_v13 = vld [vmem:[%s1514_s1 + $0x338] sm:$0xff] }
  0x3d   :  { %134 = vmatpush.msra.mxu2 %v101_v32  ;;  %383 = vmatpush.msrb.mxu3 %v697_v58  ;;  %v777_v14 = vld [vmem:[%s1515_s2] ss:$0 sm:$0xff]  ;;  %v732_v15 = vld [vmem:[%s1514_s1 + $0x330] sm:$0xff]  ;;  %v731_v19 = vld [vmem:[%s1514_s1 + $0x328] sm:$0xff] }
  0x3e   :  { %239 = vmatpush.msrb.mxu0 %v643_v31  ;;  %280 = vmatpush.msrb.mxu1 %v662_v56  ;;  %v730_v21 = vld [vmem:[%s1514_s1 + $0x320] sm:$0xff]  ;;  %v757_v23 = vld [vmem:[%s1514_s1 + $0x3f8] sm:$0xff]  ;;  %v728_v25 = vld [vmem:[%s1514_s1 + $0x310] sm:$0xff] }
  0x3f   :  { %135 = vmatpush.msra.mxu2 %v100_v35  ;;  %384 = vmatpush.msrb.mxu3 %v696_v61  ;;  %v729_v24 = vld [vmem:[%s1514_s1 + $0x318] sm:$0xff]  ;;  %v756_v26 = vld [vmem:[%s1514_s1 + $0x3f0] sm:$0xff]  ;;  %v727_v27 = vld [vmem:[%s1514_s1 + $0x308] sm:$0xff] }
  0x40   :  { %240 = vmatpush.msrb.mxu0 %v642_v33  ;;  %281 = vmatpush.msrb.mxu1 %v661_v59  ;;  %v755_v28 = vld [vmem:[%s1514_s1 + $0x3e8] sm:$0xff]  ;;  %v726_v29 = vld [vmem:[%s1514_s1 + $0x300] sm:$0xff]  ;;  %v753_v32 = vld [vmem:[%s1514_s1 + $0x3d8] sm:$0xff] }
  0x41   :  { %241 = vmatmul.f32.vlgmr.msrb.gmra.mxu0 %v166_v34  ;;  %353 = vmatpush.msrb.mxu2 %v691_v36  ;;  %v754_v30 = vld [vmem:[%s1514_s1 + $0x3e0] sm:$0xff]  ;;  %v724_v33 = vld [vmem:[%s1516_s3 + $0x178] sm:$0xff]  ;;  %v723_v34 = vld [vmem:[%s1516_s3 + $0x170] sm:$0xff] }
  0x42   :  { %282 = vmatpush.msrb.mxu1 %v660_v62  ;;  %385 = vmatpush.msrb.mxu3 %v695_v63  ;;  %v313_v31 = vld [vmem:[%s1513_s0 + $0x20] sm:$0xff]  ;;  %v752_v35 = vld [vmem:[%s1514_s1 + $0x3d0] sm:$0xff]  ;;  %v722_v36 = vld [vmem:[%s1516_s3 + $0x168] sm:$0xff] }
  0x43   :  { %354 = vmatpush.msrb.mxu2 %v690_v37  ;;  %416 = vmatpush.msra.mxu0 %v724_v33  ;;  %v751_v37 = vld [vmem:[%s1514_s1 + $0x3c8] sm:$0xff]  ;;  %v717_v47 = vld [vmem:[%s1516_s3 + $0x140] sm:$0xff]  ;;  %v744_v52 = vld [vmem:[%s1514_s1 + $0x390] sm:$0xff] }
  0x44   :  { %283 = vmatpush.msrb.mxu1 %v659_v0  ;;  %386 = vmatpush.msrb.mxu3 %v694_v1  ;;  %v746_v49 = vld [vmem:[%s1514_s1 + $0x3a0] sm:$0xff]  ;;  %v743_v55 = vld [vmem:[%s1514_s1 + $0x388] sm:$0xff]  ;;  %v462_v58 = vld [vmem:[%s1513_s0 + $0x38] sm:$0xff] }
  0x45   :  { %355 = vmatpush.msrb.mxu2 %v689_v38  ;;  %417 = vmatpush.msra.mxu0 %v723_v34  ;;  %v721_v38 = vld [vmem:[%s1516_s3 + $0x160] sm:$0xff]  ;;  %v461_v59 = vld [vmem:[%s1513_s0 + $0x30] sm:$0xff]  ;;  %v714_v62 = vld [vmem:[%s1516_s3 + $0x128] sm:$0xff] }
  0x46   :  { %501 = vmatpush.msra.mxu1 %v741_v2  ;;  %387 = vmatpush.msrb.mxu3 %v693_v3  ;;  %v715_v61 = vld [vmem:[%s1516_s3 + $0x130] sm:$0xff]  ;;  %v774_v63 = vld [vmem:[%s1516_s3 + $0x1f8] sm:$0xff]  ;;  %v713_v0 = vld [vmem:[%s1516_s3 + $0x120] sm:$0xff] }
  0x47   :  { %356 = vmatpush.msrb.mxu2 %v688_v39  ;;  %418 = vmatpush.msra.mxu0 %v722_v36  ;;  %v750_v39 = vld [vmem:[%s1514_s1 + $0x3c0] sm:$0xff]  ;;  %v712_v1 = vld [vmem:[%s1516_s3 + $0x118] sm:$0xff]  ;;  %v773_v2 = vld [vmem:[%s1516_s3 + $0x1f0] sm:$0xff] }
  0x48   :  { %502 = vmatpush.msra.mxu1 %v740_v4  ;;  %388 = vmatpush.msrb.mxu3 %v692_v5  ;;  %v711_v3 = vld [vmem:[%s1516_s3 + $0x110] sm:$0xff]  ;;  %v772_v4 = vld [vmem:[%s1516_s3 + $0x1e8] sm:$0xff] }
  0x49   :  { %357 = vmatpush.msrb.mxu2 %v687_v40  ;;  %389 = vmatmul.f32.vlgmr.msrb.gmra.mxu3 %v314_v6  ;;  %v720_v40 = vld [vmem:[%s1516_s3 + $0x158] sm:$0xff]  ;;  %v710_v5 = vld [vmem:[%s1516_s3 + $0x108] sm:$0xff]  ;;  %v771_v6 = vld [vmem:[%s1516_s3 + $0x1e0] sm:$0xff] }
  0x4a   :  { %503 = vmatpush.msra.mxu1 %v739_v7  ;;  %419 = vmatpush.msra.mxu0 %v721_v38  ;;  %v709_v7 = vld [vmem:[%s1516_s3 + $0x100] sm:$0xff] }
  0x4b   :  { %358 = vmatpush.msrb.mxu2 %v686_v41  ;;  %v749_v41 = vld [vmem:[%s1514_s1 + $0x3b8] sm:$0xff]  ;;  %564 = vmatpush.msra.mxu3 %v774_v63 }
  0x4c   :  { %504 = vmatpush.msra.mxu1 %v738_v8  ;;  %420 = vmatpush.msra.mxu0 %v720_v40  ;;  %v770_v8 = vld [vmem:[%s1516_s3 + $0x1d8] sm:$0xff] }
  0x4d   :  { %359 = vmatpush.msrb.mxu2 %v685_v42  ;;  %v719_v42 = vld [vmem:[%s1516_s3 + $0x150] sm:$0xff]  ;;  %565 = vmatpush.msra.mxu3 %v773_v2 }
  0x4e   :  { %505 = vmatpush.msra.mxu1 %v737_v9  ;;  %421 = vmatpush.msra.mxu0 %v719_v42  ;;  %v769_v9 = vld [vmem:[%s1516_s3 + $0x1d0] sm:$0xff]  ;;  %v783_v42 = vld [vmem:[%s1517_s4 + $0x2] ss:$0 sm:$0xff] }
  0x4f   :  { %360 = vmatpush.msrb.mxu2 %v684_v43  ;;  %v748_v43 = vld [vmem:[%s1514_s1 + $0x3b0] sm:$0xff]  ;;  %566 = vmatpush.msra.mxu3 %v772_v4 }
  0x50   :  { %506 = vmatpush.msra.mxu1 %v736_v10  ;;  %v768_v10 = vld [vmem:[%s1516_s3 + $0x1c8] sm:$0xff] }
  0x51   :  { %361 = vmatpush.msrb.mxu2 %v683_v44  ;;  %v718_v44 = vld [vmem:[%s1516_s3 + $0x148] sm:$0xff]  ;;  %567 = vmatpush.msra.mxu3 %v771_v6 }
  0x52   :  { %507 = vmatpush.msra.mxu1 %v735_v11  ;;  %422 = vmatpush.msra.mxu0 %v718_v44  ;;  %v767_v11 = vld [vmem:[%s1516_s3 + $0x1c0] sm:$0xff] }
  0x53   :  { %362 = vmatpush.msrb.mxu2 %v682_v45  ;;  %v778_v45 = vld [vmem:[%s1515_s2 + $0x1] ss:$0 sm:$0xff]  ;;  %568 = vmatpush.msra.mxu3 %v770_v8 }
  0x54   :  { %508 = vmatpush.msra.mxu1 %v734_v12  ;;  %423 = vmatpush.msra.mxu0 %v717_v47  ;;  %v766_v12 = vld [vmem:[%s1516_s3 + $0x1b8] sm:$0xff] }
  0x55   :  { %363 = vmatpush.msrb.mxu2 %v681_v46  ;;  %v747_v46 = vld [vmem:[%s1514_s1 + $0x3a8] sm:$0xff]  ;;  %569 = vmatpush.msra.mxu3 %v769_v9 }
  0x56   :  { %509 = vmatpush.msra.mxu1 %v733_v13  ;;  %v765_v13 = vld [vmem:[%s1516_s3 + $0x1b0] sm:$0xff] }
  0x57   :  { %364 = vmatpush.msrb.mxu2 %v680_v48  ;;  %570 = vmatpush.msra.mxu3 %v768_v10 }
  0x58   :  { %510 = vmatpush.msra.mxu1 %v732_v15  ;;  %v763_v15 = vld [vmem:[%s1516_s3 + $0x1a0] sm:$0xff] }
  0x59   :  { %365 = vmatpush.msrb.mxu2 %v679_v51  ;;  %v745_v51 = vld [vmem:[%s1514_s1 + $0x398] sm:$0xff]  ;;  %571 = vmatpush.msra.mxu3 %v767_v11 }
  0x5a   :  { %511 = vmatpush.msra.mxu1 %v731_v19 }
  0x5b   :  { %366 = vmatpush.msrb.mxu2 %v678_v54  ;;  %572 = vmatpush.msra.mxu3 %v766_v12 }
  0x5c   :  { %512 = vmatpush.msra.mxu1 %v730_v21  ;;  %v760_v21 = vld [vmem:[%s1516_s3 + $0x188] sm:$0xff] }
  0x5d   :  { %367 = vmatpush.msrb.mxu2 %v677_v57  ;;  %v742_v57 = vld [vmem:[%s1514_s1 + $0x380] sm:$0xff]  ;;  %573 = vmatpush.msra.mxu3 %v765_v13 }
  0x5e   :  { %513 = vmatpush.msra.mxu1 %v729_v24 }
  0x5f   :  { %368 = vmatpush.msrb.mxu2 %v676_v60  ;;  %v716_v60 = vld [vmem:[%s1516_s3 + $0x138] sm:$0xff] }
  0x60   :  { %514 = vmatpush.msra.mxu1 %v728_v25  ;;  %424 = vmatpush.msra.mxu0 %v716_v60 }
  0x62   :  { %515 = vmatpush.msra.mxu1 %v727_v27  ;;  %425 = vmatpush.msra.mxu0 %v715_v61 }
  0x64   :  { %516 = vmatpush.msra.mxu1 %v726_v29  ;;  %426 = vmatpush.msra.mxu0 %v714_v62  ;;  %v781_v29 = vld [vmem:[%s1517_s4 + $0x1] ss:$0 sm:$0xff] }
  0x66   :  { %427 = vmatpush.msra.mxu0 %v713_v0 }
  0x68   :  { %428 = vmatpush.msra.mxu0 %v712_v1 }
  0x6a   :  { %429 = vmatpush.msra.mxu0 %v711_v3 }
  0x6c   :  { %430 = vmatpush.msra.mxu0 %v710_v5 }
  0x6e   :  { %431 = vmatpush.msra.mxu0 %v709_v7 }
  0x9e   :  { %v76_v16 = vpop.f32.mrf.mxu0 }
  0x9f   :  { %v96_v17 = vpop.f32.mrf.mxu1  ;;  %v77_v18 = vadd.f32 %v777_v14, %v76_v16  ;;  %v764_v14 = vld [vmem:[%s1516_s3 + $0x1a8] sm:$0xff]  ;;  %v779_v16 = vld [vmem:[%s1517_s4] ss:$0 sm:$0xff] }
  0xa0   :  { %574 = vmatpush.msra.mxu3 %v764_v14 }
  0xa1   :  { %v97_v20 = vadd.f32 %v96_v17, %v77_v18  ;;  %v762_v17 = vld [vmem:[%s1516_s3 + $0x198] sm:$0xff] }
  0xa2   :  { %575 = vmatpush.msra.mxu3 %v763_v15 }
  0xa3   :  { %v99_v22 = vmax.f32 %v97_v20, 0.0  ;;  %v761_v20 = vld [vmem:[%s1516_s3 + $0x190] sm:$0xff] }
  0xa4   :  { %576 = vmatpush.msra.mxu3 %v762_v17 }
  0xa5   :  { %136 = vmatmul.f32.vlgmr.msra.gmra.mxu2 %v99_v22  ;;  %v780_v22 = vld [vmem:[%s1515_s2 + $0x2] ss:$0 sm:$0xff] }
  0xa6   :  { %521 = vmatpush.msra.mxu2 %v757_v23  ;;  %577 = vmatpush.msra.mxu3 %v761_v20  ;;  %v759_v23 = vld [vmem:[%s1516_s3 + $0x180] sm:$0xff] }
  0xa8   :  { %522 = vmatpush.msra.mxu2 %v756_v26  ;;  %578 = vmatpush.msra.mxu3 %v760_v21 }
  0xaa   :  { %523 = vmatpush.msra.mxu2 %v755_v28  ;;  %579 = vmatpush.msra.mxu3 %v759_v23 }
  0xab   :  { %v222_v48 = vpop.f32.mrf.mxu3 }
  0xac   :  { %524 = vmatpush.msra.mxu2 %v754_v30  ;;  %v223_v50 = vadd.f32 %v778_v45, %v222_v48 }
  0xad   :  { %369 = vmatmul.f32.vlgmr.msrb.gmra.mxu2 %v313_v31 }
  0xae   :  { %525 = vmatpush.msra.mxu2 %v753_v32  ;;  %v782_v32 = vld [vmem:[%s1515_s2 + $0x3] ss:$0 sm:$0xff] }
  0xb0   :  { %526 = vmatpush.msra.mxu2 %v752_v35 }
  0xb2   :  { %527 = vmatpush.msra.mxu2 %v751_v37 }
  0xb4   :  { %528 = vmatpush.msra.mxu2 %v750_v39 }
  0xb6   :  { %529 = vmatpush.msra.mxu2 %v749_v41 }
  0xb8   :  { %530 = vmatpush.msra.mxu2 %v748_v43 }
  0xba   :  { %531 = vmatpush.msra.mxu2 %v747_v46 }
  0xbc   :  { %532 = vmatpush.msra.mxu2 %v746_v49  ;;  %v784_v49 = vld [vmem:[%s1517_s4 + $0x3] ss:$0 sm:$0xff]  ;;  %s827_s4 = smov [#allocation2]  }
  0xbd   :  { %s615_s27 = sshll.u32 %s827_s4, 4  ;;  %s616_s27 = int_to_ptr.vmem [resolvable:$true] %s615_s27 }
  0xbe   :  { %v242_v53 = vpop.f32.mrf.mxu0  ;;  %533 = vmatpush.msra.mxu2 %v745_v51 }
  0xbf   :  { %v243_v54 = vadd.f32 %v242_v53, %v223_v50 }
  0xc0   :  { %534 = vmatpush.msra.mxu2 %v744_v52 }
  0xc1   :  { %v245_v56 = vmax.f32 %v243_v54, 0.0 }
  0xc2   :  { %535 = vmatpush.msra.mxu2 %v743_v55 }
  0xc3   :  { %284 = vmatmul.f32.vlgmr.msrb.gmra.mxu1 %v245_v56 }
  0xc4   :  { %536 = vmatpush.msra.mxu2 %v742_v57 }
  0xc5   :  { %537 = vmatmul.f32.vlgmr.msra.gmra.mxu2 %v462_v58 }
  0xcb   :  { %517 = vmatmul.f32.vlgmr.msra.gmra.mxu1 %v461_v59 }
  0xcc   :  { %v390_v25 = vpop.f32.mrf.mxu3 }
 0x128   :  { %v137_v18 = vpop.f32.mrf.mxu2 }
 0x129   :  { %v138_v19 = vadd.f32 %v779_v16, %v137_v18 }
 0x12b   :  { %140 = vmax.xlane.f32.xlu0 %v138_v19 }
 0x130   :  { %v370_v24 = vpop.f32.mrf.mxu2 }
 0x131   :  { %v371_v26 = vadd.f32 %v780_v22, %v370_v24 }
 0x133   :  { %v391_v27 = vadd.f32 %v390_v25, %v371_v26 }
 0x135   :  { %v393_v28 = vmax.f32 %v391_v27, 0.0 }
 0x137   :  { %432 = vmatmul.f32.vlgmr.msra.gmra.mxu0 %v393_v28 }
 0x140   :  { %v285_v30 = vpop.f32.mrf.mxu1 }
 0x141   :  { %v286_v31 = vadd.f32 %v781_v29, %v285_v30 }
 0x143   :  { %288 = vmax.xlane.f32.xlu0 %v286_v31 }
 0x148   :  { %v518_v33 = vpop.f32.mrf.mxu1  ;;  %v538_v34 = vpop.f32.mrf.mxu2 }
 0x149   :  { %v519_v35 = vadd.f32 %v782_v32, %v518_v33 }
 0x14b   :  { %v539_v36 = vadd.f32 %v538_v34, %v519_v35 }
 0x14d   :  { %v541_v37 = vmax.f32 %v539_v36, 0.0 }
 0x14f   :  { %580 = vmatmul.f32.vlgmr.msra.gmra.mxu3 %v541_v37 }
 0x19e   :  { %v141_v38 = vpop.xlane.xlu0 %140 }
 0x19f   :  { %v142_v39 = vsub.f32 %v138_v19, %v141_v38 }
 0x1a1   :  { %v143_v40 = vmul.f32 1.442695, %v142_v39 }
 0x1a3   :  { %785 = vpow2.f32 %v143_v40 }
 0x1a9   :  { %v1476_v41 = vpop.eup %785 }
 0x1aa   :  { %145 = vadd.xlane.f32.xlu2 %v1476_v41 }
 0x1b4   :  { %v433_v43 = vpop.f32.mrf.mxu0 }
 0x1b5   :  { %v434_v44 = vadd.f32 %v783_v42, %v433_v43 }
 0x1b6   :  { %v289_v45 = vpop.xlane.xlu0 %288 }
 0x1b7   :  { %v290_v46 = vsub.f32 %v286_v31, %v289_v45  ;;  %436 = vmax.xlane.f32.xlu1 %v434_v44 }
 0x1b9   :  { %v291_v47 = vmul.f32 1.442695, %v290_v46 }
 0x1bb   :  { %787 = vpow2.f32 %v291_v47 }
 0x1c1   :  { %v1482_v48 = vpop.eup %787 }
 0x1c2   :  { %293 = vadd.xlane.f32.xlu2 %v1482_v48 }
 0x1d2   :  { %v581_v50 = vpop.f32.mrf.mxu3 }
 0x1d3   :  { %v582_v51 = vadd.f32 %v784_v49, %v581_v50 }
 0x1d5   :  { %584 = vmax.xlane.f32.xlu1 %v582_v51 }
 0x21d   :  { %v146_v60 = vpop.xlane.xlu2 %145 }
 0x21e   :  { %v147_v0 = vmul.f32 4.0, %v146_v60 }
 0x220   :  { %vm153_vm4 = vweird.f32 %v147_v0  ;;  %v159_v21 = vand.u32 2147483648, %v147_v0  ;;  %v157_v25 = vand.u32 2147483647, %v147_v0 }
 0x222   :  { %v160_v33 = vor.u32 1.1754944e-38, %v159_v21  ;;  %vm158_vm10 = vcmp.eq.f32.partialorder %v157_v25, 8.507059e+37 }
 0x22a   :  { %v437_v52 = vpop.xlane.xlu1 %436 }
 0x22b   :  { %v438_v53 = vsub.f32 %v434_v44, %v437_v52 }
 0x22d   :  { %v439_v54 = vmul.f32 1.442695, %v438_v53 }
 0x22f   :  { %789 = vpow2.f32 %v439_v54 }
 0x235   :  { %v1488_v55 = vpop.eup %789  ;;  %v294_v61 = vpop.xlane.xlu2 %293 }
 0x236   :  { %441 = vadd.xlane.f32.xlu0 %v1488_v55  ;;  %v295_v63 = vmul.f32 4.0, %v294_v61 }
 0x238   :  { %v307_v18 = vand.u32 2147483648, %v295_v63  ;;  %vm301_vm2 = vweird.f32 %v295_v63  ;;  %v305_v19 = vand.u32 2147483647, %v295_v63 }
 0x23a   :  { %v308_v29 = vor.u32 1.1754944e-38, %v307_v18  ;;  %vm306_vm9 = vcmp.eq.f32.partialorder %v305_v19, 8.507059e+37 }
 0x248   :  { %v585_v56 = vpop.xlane.xlu1 %584 }
 0x249   :  { %v586_v57 = vsub.f32 %v582_v51, %v585_v56 }
 0x24b   :  { %v587_v58 = vmul.f32 1.442695, %v586_v57 }
 0x24d   :  { %791 = vpow2.f32 %v587_v58 }
 0x24e   :  { %793 = vrcp.f32 %v295_v63 }
 0x24f   :  { %795 = vrcp.f32 %v147_v0 }
 0x253   :  { %v1491_v59 = vpop.eup %791 }
 0x254   :  { %589 = vadd.xlane.f32.xlu1 %v1491_v59  ;;  %v794_v2 = vpop.eup %793 }
 0x255   :  { %v796_v3 = vpop.eup %795  ;;  %v297_v5 = vmul.f32 %v794_v2, %v295_v63  ;;  %vm302_vm0 = vweird.f32 %v794_v2 }
 0x256   :  { %v149_v6 = vmul.f32 %v796_v3, %v147_v0  ;;  %vm154_vm1 = vweird.f32 %v796_v3  ;;  %vm1494_vm5 = vmor %vm301_vm2, %vm302_vm0 }
 0x257   :  { %v298_v8 = vsub.f32 1.0, %v297_v5  ;;  %vm1498_vm6 = vmor %vm153_vm4, %vm154_vm1 }
 0x258   :  { %v150_v9 = vsub.f32 1.0, %v149_v6 }
 0x259   :  { %v299_v11 = vmul.f32 %v794_v2, %v298_v8 }
 0x25a   :  { %v151_v13 = vmul.f32 %v796_v3, %v150_v9 }
 0x25b   :  { %v300_v16 = vadd.f32 %v794_v2, %v299_v11 }
 0x25c   :  { %v152_v17 = vadd.f32 %v796_v3, %v151_v13 }
 0x25d   :  { %v304_v26 = vsel %vm1494_vm5, %v794_v2, %v300_v16 }
 0x25e   :  { %v156_v31 = vsel %vm1498_vm6, %v796_v3, %v152_v17  ;;  %v309_v35 = vsel %vm306_vm9, %v308_v29, %v304_v26 }
 0x25f   :  { %v161_v37 = vsel %vm158_vm10, %v160_v33, %v156_v31  ;;  %v311_v42 = vmul.f32 %v1482_v48, %v309_v35 }
 0x260   :  { %v163_v44 = vmul.f32 %v1476_v41, %v161_v37 }
 0x262   :  { %v312_v49 = vadd.f32 %v311_v42, %v163_v44 }
 0x2a9   :  { %v442_v62 = vpop.xlane.xlu0 %441 }
 0x2aa   :  { %v443_v1 = vmul.f32 4.0, %v442_v62 }
 0x2ac   :  { %797 = vrcp.f32 %v443_v1  ;;  %v455_v23 = vand.u32 2147483648, %v443_v1  ;;  %vm449_vm7 = vweird.f32 %v443_v1  ;;  %v453_v27 = vand.u32 2147483647, %v443_v1 }
 0x2ae   :  { %v456_v34 = vor.u32 1.1754944e-38, %v455_v23  ;;  %vm454_vm11 = vcmp.eq.f32.partialorder %v453_v27, 8.507059e+37 }
 0x2b2   :  { %v798_v4 = vpop.eup %797 }
 0x2b3   :  { %v445_v7 = vmul.f32 %v798_v4, %v443_v1  ;;  %vm450_vm3 = vweird.f32 %v798_v4 }
 0x2b4   :  { %vm451_vm8 = vmor %vm449_vm7, %vm450_vm3 }
 0x2b5   :  { %v446_v10 = vsub.f32 1.0, %v445_v7 }
 0x2b7   :  { %v447_v15 = vmul.f32 %v798_v4, %v446_v10 }
 0x2b9   :  { %v448_v20 = vadd.f32 %v798_v4, %v447_v15 }
 0x2bb   :  { %v452_v32 = vsel %vm451_vm8, %v798_v4, %v448_v20 }
 0x2bc   :  { %v457_v38 = vsel %vm454_vm11, %v456_v34, %v452_v32 }
 0x2bd   :  { %v459_v45 = vmul.f32 %v1488_v55, %v457_v38 }
 0x2bf   :  { %v460_v48 = vadd.f32 %v459_v45, %v312_v49 }
 0x2c7   :  { %v590_v12 = vpop.xlane.xlu1 %589 }
 0x2c8   :  { %v591_v14 = vmul.f32 4.0, %v590_v12 }
 0x2ca   :  { %799 = vrcp.f32 %v591_v14  ;;  %v603_v39 = vand.u32 2147483648, %v591_v14  ;;  %v601_v43 = vand.u32 2147483647, %v591_v14  ;;  %vm597_vm13 = vweird.f32 %v591_v14 }
 0x2cc   :  { %v604_v47 = vor.u32 1.1754944e-38, %v603_v39  ;;  %vm602_vm15 = vcmp.eq.f32.partialorder %v601_v43, 8.507059e+37 }
 0x2d0   :  { %v800_v28 = vpop.eup %799 }
 0x2d1   :  { %v593_v30 = vmul.f32 %v800_v28, %v591_v14  ;;  %vm598_vm12 = vweird.f32 %v800_v28 }
 0x2d2   :  { %vm599_vm14 = vmor %vm597_vm13, %vm598_vm12 }
 0x2d3   :  { %v594_v36 = vsub.f32 1.0, %v593_v30 }
 0x2d5   :  { %v595_v40 = vmul.f32 %v800_v28, %v594_v36 }
 0x2d7   :  { %v596_v46 = vadd.f32 %v800_v28, %v595_v40 }
 0x2d9   :  { %v600_v50 = vsel %vm599_vm14, %v800_v28, %v596_v46 }
 0x2da   :  { %v605_v51 = vsel %vm602_vm15, %v604_v47, %v600_v50 }
 0x2db   :  { %v607_v52 = vmul.f32 %v1491_v59, %v605_v51 }
 0x2dd   :  { %v608_v53 = vadd.f32 %v607_v52, %v460_v48 }
 0x2df   :  { %609 = vst [vmem:[#allocation2] sm:$0xff] %v608_v53 }
 0x2e0   :  { %620 = dma.vmem_to_hbm [thread:$0]  %s616_s27, 128, %s618_s30, [#allocation3]  }
 0x2e1   :  { %825 = dma.done.wait [#allocation3], 128  }
 0x2e2   :  { %826 = vsyncadd [#allocation3], 4294967168 }
 0x2e3   :  { %625 = vsyncpa [#allocation3], 1 }

</bundles_post_ra>
